<compile_context>
chip_gen: v6e
topology: v6e:2x2x1
jax: 0.10.0
libtpu: 0.0.40
codegen_flags: <defaults>
</compile_context>

<pallas_src>
import jax
import jax.numpy as jnp
from jax.experimental import pallas as pl
from jax.experimental.pallas import tpu as pltpu

H1 = 128       # hidden 1
H2 = 32        # real hidden 2 width
H2_PAD = 128   # lane-dense padded hidden 2 width (zero-padded, exact)
D_OUT = 3      # output width (stored unpadded)


def _round_up(n, m):
    return ((n + m - 1) // m) * m


def mlp_kernel(x_ref, w1_ref, b1_ref, w2_ref, b2_ref, w3_ref, b3_ref, o_ref):
    # Layer 1: Linear + ReLU (MXU matmul, f32 accumulation; bias/ReLU in f32).
    h1 = jnp.dot(x_ref[...], w1_ref[...], preferred_element_type=jnp.float32)
    h1 = jnp.maximum(h1 + b1_ref[...], 0.0)
    # Dropout(0.5): identity in eval mode.

    # Layer 2: Linear + ReLU.  MXU operands in storage dtype (bf16 optional),
    # elementwise math stays f32.  N padded to 128 lanes (zero cols -> exact).
    h2 = jnp.dot(h1.astype(w2_ref.dtype), w2_ref[...],
                 preferred_element_type=jnp.float32)
    h2 = jnp.maximum(h2 + b2_ref[...], 0.0)
    # Dropout(0.5): identity in eval mode.

    # Output layer: Linear to the true 3-wide output (contiguous 12 B/row store;
    # masked vst cost is negligible and saves ~40x output HBM bytes vs a
    # 128-lane f32 pad).
    out = jnp.dot(h2.astype(w3_ref.dtype), w3_ref[...],
                  preferred_element_type=jnp.float32)
    o_ref[...] = (out + b3_ref[...]).astype(o_ref.dtype)


def custom_model_forward(x, w1, b1, w2, b2, w3, b3, *,
                         tile_m=2048, compute_dtype=jnp.float32,
                         core_parallel=False):
    """x: (B, input_node).  Weights stored as (in_features, out_features), i.e.
    transposed vs PyTorch nn.Linear, so the kernel computes x @ W + b.
    Returns (B, 3) float32.

    compute_dtype=jnp.bfloat16 halves the x/weight HBM traffic on every TPU
    generation (incl. v5e): only MXU operands are bf16, all bias/ReLU math and
    accumulation stay f32."""
    B, D_in = x.shape
    assert w1.shape == (D_in, H1) and b1.shape == (H1,)
    assert w2.shape == (H1, H2) and b2.shape == (H2,)
    assert w3.shape == (H2, D_OUT) and b3.shape == (D_OUT,)

    # Batch tile: multiple of 8 (sublane constraint), capped by tile_m.
    tm = min(tile_m, max(8, _round_up(B, 8)))
    grid = (pl.cdiv(B, tm),)   # Pallas masks the ragged last block (no host pad).

    # Storage-dtype cast for the streamed / MXU operands.
    xp = x.astype(compute_dtype)
    w1c = w1.astype(compute_dtype)

    # Zero-pad the hidden width 32 -> 128 (exact): zero weight columns + zero
    # bias -> relu(0)=0, and the matching w3 rows are zero, so the result is
    # bit-identical while keeping h2 full-lane.
    w2p = jnp.zeros((H1, H2_PAD), compute_dtype).at[:, :H2].set(
        w2.astype(compute_dtype))
    b2p = jnp.zeros((1, H2_PAD), jnp.float32).at[:, :H2].set(
        b2.astype(jnp.float32))
    w3p = jnp.zeros((H2_PAD, D_OUT), compute_dtype).at[:H2, :].set(
        w3.astype(compute_dtype))

    # Biases stay f32 as (1, N) rows that broadcast inside the kernel.
    b1_2d = b1.astype(jnp.float32).reshape(1, H1)
    b3_2d = b3.astype(jnp.float32).reshape(1, D_OUT)

    itemsize = jnp.dtype(compute_dtype).itemsize
    cost = pl.CostEstimate(
        flops=2 * B * (D_in * H1 + H1 * H2_PAD + H2_PAD * D_OUT),
        transcendentals=0,
        bytes_accessed=(B * D_in * itemsize                               # x stream
                        + (D_in * H1 + H1 * H2_PAD + H2_PAD * D_OUT) * itemsize
                        + (H1 + H2_PAD + D_OUT) * 4                      # biases
                        + B * D_OUT * 4),                                # output
    )

    # v7x: CORE_PARALLEL splits batch tiles across the 2 TensorCores.
    batch_sem = pltpu.CORE_PARALLEL if core_parallel else "parallel"

    out = pl.pallas_call(
        mlp_kernel,
        out_shape=jax.ShapeDtypeStruct((B, D_OUT), jnp.float32),
        grid=grid,
        in_specs=[
            pl.BlockSpec((tm, D_in), lambda i: (i, 0)),        # x tile (pipelined)
            pl.BlockSpec((D_in, H1), lambda i: (0, 0)),        # weights/biases stay
            pl.BlockSpec((1, H1), lambda i: (0, 0)),           # VMEM-resident
            pl.BlockSpec((H1, H2_PAD), lambda i: (0, 0)),
            pl.BlockSpec((1, H2_PAD), lambda i: (0, 0)),
            pl.BlockSpec((H2_PAD, D_OUT), lambda i: (0, 0)),
            pl.BlockSpec((1, D_OUT), lambda i: (0, 0)),
        ],
        out_specs=pl.BlockSpec((tm, D_OUT), lambda i: (i, 0)),
        compiler_params=pltpu.CompilerParams(
            dimension_semantics=(batch_sem,)),
        cost_estimate=cost,
    )(xp, w1c, b1_2d, w2p, b2p, w3p, b3_2d)

    return out


def reference_forward(x, w1, b1, w2, b2, w3, b3):
    h = jnp.maximum(x @ w1 + b1, 0.0)
    h = jnp.maximum(h @ w2 + b2, 0.0)
    return h @ w3 + b3


if __name__ == "__main__":
    key = jax.random.PRNGKey(0)
    k_x, k_w1, k_b1, k_w2, k_b2, k_w3, k_b3 = jax.random.split(key, 7)

    B = 8            # small demo batch
    input_node = 32  # input feature dimension

    def init_w(k, fan_in, fan_out):
        bound = 1.0 / (fan_in ** 0.5)
        return jax.random.uniform(k, (fan_in, fan_out), jnp.float32, -bound, bound)

    def init_b(k, fan_in, fan_out):
        bound = 1.0 / (fan_in ** 0.5)
        return jax.random.uniform(k, (fan_out,), jnp.float32, -bound, bound)

    x = jax.random.normal(k_x, (B, input_node), jnp.float32)
    w1 = init_w(k_w1, input_node, 128)
    b1 = init_b(k_b1, input_node, 128)
    w2 = init_w(k_w2, 128, 32)
    b2 = init_b(k_b2, 128, 32)
    w3 = init_w(k_w3, 32, 3)
    b3 = init_b(k_b3, 32, 3)

    ref = reference_forward(x, w1, b1, w2, b2, w3, b3)

    # f32 path (exact parity with the PyTorch eval-mode forward).
    out = custom_model_forward(x, w1, b1, w2, b2, w3, b3)
    out = jax.block_until_ready(out)
    assert out.shape == (B, D_OUT)
    assert jnp.allclose(out, ref, atol=1e-4, rtol=1e-4), "f32 mismatch vs reference"

    # bf16 storage path (recommended on all generations); f32 accumulation,
    # looser tolerance because x and weights themselves are rounded to bf16.
    out_bf16 = custom_model_forward(x, w1, b1, w2, b2, w3, b3,
                                    compute_dtype=jnp.bfloat16)
    out_bf16 = jax.block_until_ready(out_bf16)
    assert out_bf16.shape == (B, D_OUT)
    assert jnp.allclose(out_bf16, ref, atol=5e-2, rtol=5e-2), "bf16 mismatch vs reference"

    print("KERNEL_OK")
</pallas_src>

<mosaic_0001>
module attributes {stable_mosaic.version = 11 : i64} {
  func.func @mlp_kernel(%arg0: i32, %arg1: memref<8x32xf32, #tpu.memory_space<vmem>>, %arg2: memref<32x128xf32, #tpu.memory_space<vmem>>, %arg3: memref<1x128xf32, #tpu.memory_space<vmem>>, %arg4: memref<128x128xf32, #tpu.memory_space<vmem>>, %arg5: memref<1x128xf32, #tpu.memory_space<vmem>>, %arg6: memref<128x3xf32, #tpu.memory_space<vmem>>, %arg7: memref<1x3xf32, #tpu.memory_space<vmem>>, %arg8: memref<8x3xf32, #tpu.memory_space<vmem>>) attributes {dimension_semantics = [#tpu.dimension_semantics<parallel>], iteration_bounds = array<i64: 1>, scalar_prefetch = 0 : i64, scratch_operands = 0 : i64, tpu.core_type = #tpu.core_type<tc>, window_params = [{transform_indices = @transform_0, window_bounds = array<i64: 8, 32>}, {pipeline_mode = #tpu.pipeline_mode<synchronous>, transform_indices = @transform_1, window_bounds = array<i64: 32, 128>}, {pipeline_mode = #tpu.pipeline_mode<synchronous>, transform_indices = @transform_2, window_bounds = array<i64: 1, 128>}, {pipeline_mode = #tpu.pipeline_mode<synchronous>, transform_indices = @transform_3, window_bounds = array<i64: 128, 128>}, {pipeline_mode = #tpu.pipeline_mode<synchronous>, transform_indices = @transform_4, window_bounds = array<i64: 1, 128>}, {pipeline_mode = #tpu.pipeline_mode<synchronous>, transform_indices = @transform_5, window_bounds = array<i64: 128, 3>}, {pipeline_mode = #tpu.pipeline_mode<synchronous>, transform_indices = @transform_6, window_bounds = array<i64: 1, 3>}, {transform_indices = @transform_7, window_bounds = array<i64: 8, 3>}]} {
    %c0 = arith.constant 0 : index
    %c0_0 = arith.constant 0 : index
    %0 = vector.load %arg1[%c0, %c0_0] : memref<8x32xf32, #tpu.memory_space<vmem>>, vector<8x32xf32>
    %c0_1 = arith.constant 0 : index
    %c0_2 = arith.constant 0 : index
    %1 = vector.load %arg2[%c0_1, %c0_2] : memref<32x128xf32, #tpu.memory_space<vmem>>, vector<32x128xf32>
    %cst = arith.constant dense<0.000000e+00> : vector<8x128xf32>
    %2 = tpu.matmul %0, %1, %cst {dimension_numbers = #tpu.dot_dimension_numbers<[1], [0], [0], [1], [0, 0, 1, 1], [], []>} : vector<8x32xf32>, vector<32x128xf32>, vector<8x128xf32> -> vector<8x128xf32>
    %c0_3 = arith.constant 0 : index
    %c0_4 = arith.constant 0 : index
    %3 = vector.load %arg3[%c0_3, %c0_4] : memref<1x128xf32, #tpu.memory_space<vmem>>, vector<1x128xf32>
    %4 = vector.broadcast %3 : vector<1x128xf32> to vector<8x128xf32>
    %5 = arith.addf %2, %4 : vector<8x128xf32>
    %cst_5 = arith.constant 0.000000e+00 : f32
    %6 = vector.broadcast %cst_5 : f32 to vector<8x128xf32>
    %7 = arith.maximumf %5, %6 : vector<8x128xf32>
    %c0_6 = arith.constant 0 : index
    %c0_7 = arith.constant 0 : index
    %8 = vector.load %arg4[%c0_6, %c0_7] : memref<128x128xf32, #tpu.memory_space<vmem>>, vector<128x128xf32>
    %cst_8 = arith.constant dense<0.000000e+00> : vector<8x128xf32>
    %9 = tpu.matmul %7, %8, %cst_8 {dimension_numbers = #tpu.dot_dimension_numbers<[1], [0], [0], [1], [0, 0, 1, 1], [], []>} : vector<8x128xf32>, vector<128x128xf32>, vector<8x128xf32> -> vector<8x128xf32>
    %c0_9 = arith.constant 0 : index
    %c0_10 = arith.constant 0 : index
    %10 = vector.load %arg5[%c0_9, %c0_10] : memref<1x128xf32, #tpu.memory_space<vmem>>, vector<1x128xf32>
    %11 = vector.broadcast %10 : vector<1x128xf32> to vector<8x128xf32>
    %12 = arith.addf %9, %11 : vector<8x128xf32>
    %cst_11 = arith.constant 0.000000e+00 : f32
    %13 = vector.broadcast %cst_11 : f32 to vector<8x128xf32>
    %14 = arith.maximumf %12, %13 : vector<8x128xf32>
    %c0_12 = arith.constant 0 : index
    %c0_13 = arith.constant 0 : index
    %15 = vector.load %arg6[%c0_12, %c0_13] : memref<128x3xf32, #tpu.memory_space<vmem>>, vector<128x3xf32>
    %cst_14 = arith.constant dense<0.000000e+00> : vector<8x3xf32>
    %16 = tpu.matmul %14, %15, %cst_14 {dimension_numbers = #tpu.dot_dimension_numbers<[1], [0], [0], [1], [0, 0, 1, 1], [], []>} : vector<8x128xf32>, vector<128x3xf32>, vector<8x3xf32> -> vector<8x3xf32>
    %c0_15 = arith.constant 0 : index
    %c0_16 = arith.constant 0 : index
    %17 = vector.load %arg7[%c0_15, %c0_16] : memref<1x3xf32, #tpu.memory_space<vmem>>, vector<1x3xf32>
    %18 = vector.broadcast %17 : vector<1x3xf32> to vector<8x3xf32>
    %19 = arith.addf %16, %18 : vector<8x3xf32>
    %c0_17 = arith.constant 0 : index
    %c0_18 = arith.constant 0 : index
    %20 = vector.load %arg8[%c0_17, %c0_18] : memref<8x3xf32, #tpu.memory_space<vmem>>, vector<8x3xf32>
    tpu.vector_store %arg8[%c0_17, %c0_18], %19 {strides = array<i32>} : memref<8x3xf32, #tpu.memory_space<vmem>>, vector<8x3xf32>,
    return
  }
  func.func @transform_0(%arg0: i32) -> (i32, i32) {
    %c0_i32 = arith.constant 0 : i32
    %c0_i32_0 = arith.constant 0 : i32
    return %arg0, %c0_i32 : i32, i32
  }
  func.func @transform_1(%arg0: i32) -> (i32, i32) {
    %c0_i32 = arith.constant 0 : i32
    %c0_i32_0 = arith.constant 0 : i32
    %c0_i32_1 = arith.constant 0 : i32
    return %c0_i32, %c0_i32_0 : i32, i32
  }
  func.func @transform_2(%arg0: i32) -> (i32, i32) {
    %c0_i32 = arith.constant 0 : i32
    %c0_i32_0 = arith.constant 0 : i32
    %c0_i32_1 = arith.constant 0 : i32
    return %c0_i32, %c0_i32_0 : i32, i32
  }
  func.func @transform_3(%arg0: i32) -> (i32, i32) {
    %c0_i32 = arith.constant 0 : i32
    %c0_i32_0 = arith.constant 0 : i32
    %c0_i32_1 = arith.constant 0 : i32
    return %c0_i32, %c0_i32_0 : i32, i32
  }
  func.func @transform_4(%arg0: i32) -> (i32, i32) {
    %c0_i32 = arith.constant 0 : i32
    %c0_i32_0 = arith.constant 0 : i32
    %c0_i32_1 = arith.constant 0 : i32
    return %c0_i32, %c0_i32_0 : i32, i32
  }
  func.func @transform_5(%arg0: i32) -> (i32, i32) {
    %c0_i32 = arith.constant 0 : i32
    %c0_i32_0 = arith.constant 0 : i32
    %c0_i32_1 = arith.constant 0 : i32
    return %c0_i32, %c0_i32_0 : i32, i32
  }
  func.func @transform_6(%arg0: i32) -> (i32, i32) {
    %c0_i32 = arith.constant 0 : i32
    %c0_i32_0 = arith.constant 0 : i32
    %c0_i32_1 = arith.constant 0 : i32
    return %c0_i32, %c0_i32_0 : i32, i32
  }
  func.func @transform_7(%arg0: i32) -> (i32, i32) {
    %c0_i32 = arith.constant 0 : i32
    %c0_i32_0 = arith.constant 0 : i32
    return %arg0, %c0_i32 : i32, i32
  }
}

</mosaic_0001>

<bundles_post_ra>
// kernel: tpu_custom_call.1
= control target key start
LH: loop header
LB: loop body
LE: loop exit
PB: predicated region body
PF: predicated region fallthrough
CT: control target
= control target key end

     0   :  { %12 = vsyncpa [#allocation3], 0  ;;  %s710_s0 = inlined_call_operand.vmem [shape: f32[8,32], index: 0, kind: input, shape index: {}]   ;;  %s711_s1 = inlined_call_operand.hbm [shape: f32[32,128], index: 1, kind: input, shape index: {}]   ;;  %s712_s2 = inlined_call_operand.vmem [shape: f32[1,128], index: 2, kind: input, shape index: {}]   ;;  %s713_s3 = inlined_call_operand.vmem [shape: f32[128,128], index: 3, kind: input, shape index: {}]   ;;  %s714_s4 = inlined_call_operand.hbm [shape: f32[1,128], index: 4, kind: input, shape index: {}]   ;;  %s715_s5 = inlined_call_operand.vmem [shape: f32[128,3], index: 5, kind: input, shape index: {}]   ;;  %s716_s6 = inlined_call_operand.vmem [shape: f32[1,3], index: 6, kind: input, shape index: {}]   ;;  %s717_s7 = inlined_call_operand.vmem [shape: f32[8,3], index: 7, kind: output, shape index: {}]  }
   0x1   :  { %13 = vsyncpa [#allocation5], 0  ;;  %s508_s24 = smov [#allocation2]  }
   0x2   :  { %s21_s25 = sshll.u32 %s508_s24, 4  ;;  %s22_s25 = int_to_ptr.vmem [resolvable:$true] %s21_s25 }
   0x3   :  { %s472_s26 = scalar_lea.vmem %s22_s25, 512  ;;  %p477_p1 = scmp.lt.s32.totalorder %s22_s25, %s22_s25 }
   0x4   :  { %p473_p0 = scmp.ne.s32.totalorder %s22_s25, %s472_s26  ;;  %p478_p2 = scmp.lt.s32.totalorder %s472_s26, %s472_s26 }
   0x6   :  { %p479_p3 = por %p478_p2, %p477_p1 }
   0x8   :  { %p480_p4 = pnand %p479_p3, %p473_p0 }
   0xa   :  { %483 = shalt.err (!%p480_p4)
}
   0xb   :  { %s509_s27 = smov 128   ;;  %s510_s28 = smov 8  }
   0xc   :  { %27 = dma.hbm_to_vmem [thread:$0]  %s711_s1, 512, %s22_s25, [#allocation3], %s509_s27, %s509_s27, %s510_s28  }
   0xd   :  { %s511_s8 = smov [#allocation4]  }
   0xe   :  { %s38_s9 = sshll.u32 %s511_s8, 4  ;;  %s39_s9 = int_to_ptr.vmem [resolvable:$true] %s38_s9 }
   0xf   :  { %s492_s10 = scalar_lea.vmem %s39_s9, 16  ;;  %s496_s11 = scalar_lea.vmem %s39_s9, 32 }
  0x10   :  { %p493_p5 = scmp.ne.s32.totalorder %s39_s9, %s492_s10  ;;  %p497_p6 = scmp.lt.s32.totalorder %s39_s9, %s39_s9 }
  0x11   :  { %p498_p7 = scmp.lt.s32.totalorder %s496_s11, %s492_s10 }
  0x13   :  { %p499_p8 = por %p498_p7, %p497_p6 }
  0x15   :  { %p500_p9 = pnand %p499_p8, %p493_p5 }
  0x17   :  { %503 = shalt.err (!%p500_p9)
}
  0x18   :  { %41 = dma.hbm_to_vmem [thread:$0]  %s714_s4, 16, %s39_s9, [#allocation5]  }
  0x19   :  { %504 = dma.done.wait [#allocation3], 512  }
  0x1a   :  { %505 = vsyncadd [#allocation3], 4294966784 }
  0x1b   :  { %506 = dma.done.wait [#allocation5], 16  }
  0x1c   :  { %507 = vsyncadd [#allocation5], 4294967280  ;;  %v512_v0 = vmov 0.0   ;;  %vm513_vm0 = vmmov 0   ;;  %v56_v1 = vld [vmem:[#allocation2 + $0x18] sm:$0xff]  ;;  %v55_v2 = vld [vmem:[#allocation2 + $0x10] sm:$0xff] }
  0x1d   :  { %377 = vmatprep.subr.mxu0 %v512_v0  ;;  %385 = vmatprep.mubr.msk.f32.mxu0 %vm513_vm0, %v512_v0  ;;  %v154_v3 = vld [vmem:[%s713_s3 + $0x78] sm:$0xff]  ;;  %v54_v4 = vld [vmem:[#allocation2 + $0x8] sm:$0xff]  ;;  %v153_v5 = vld [vmem:[%s713_s3 + $0x70] sm:$0xff]  ;;  %vm64_vm1 = vcmask 261120   ;;  %vm326_vm2 = vcmask 23552  }
  0x1e   :  { %388 = vmatprep.subr.mxu1 %v512_v0  ;;  %420 = vmatprep.mubr.msk.f32.mxu1 %vm513_vm0, %v512_v0  ;;  %v152_v6 = vld [vmem:[%s713_s3 + $0x68] sm:$0xff]  ;;  %v53_v7 = vld [vmem:[#allocation2] sm:$0xff]  ;;  %v150_v10 = vld [vmem:[%s713_s3 + $0x58] sm:$0xff] }
  0x1f   :  { %378 = vmatpush3.msra.mxu0 %v56_v1  ;;  %389 = vmatpush3.msra.mxu1 %v154_v3  ;;  %v52_v8 = vld [vmem:[%s710_s0] sm:$0xff]  ;;  %v149_v11 = vld [vmem:[%s713_s3 + $0x50] sm:$0xff]  ;;  %v148_v12 = vld [vmem:[%s713_s3 + $0x48] sm:$0xff] }
  0x20   :  { %379 = vmatprep.subr.mxu0 %v512_v0  ;;  %390 = vmatprep.subr.mxu1 %v512_v0  ;;  %v151_v9 = vld [vmem:[%s713_s3 + $0x60] sm:$0xff]  ;;  %v146_v14 = vld [vmem:[%s713_s3 + $0x38] sm:$0xff]  ;;  %v145_v15 = vld [vmem:[%s713_s3 + $0x30] sm:$0xff] }
  0x21   :  { %380 = vmatpush3.msra.mxu0 %v55_v2  ;;  %391 = vmatpush3.msra.mxu1 %v153_v5  ;;  %v147_v13 = vld [vmem:[%s713_s3 + $0x40] sm:$0xff]  ;;  %v144_v16 = vld [vmem:[%s713_s3 + $0x28] sm:$0xff]  ;;  %v142_v18 = vld [vmem:[%s713_s3 + $0x18] sm:$0xff] }
  0x22   :  { %381 = vmatprep.subr.mxu0 %v512_v0  ;;  %392 = vmatprep.subr.mxu1 %v512_v0  ;;  %v143_v17 = vld [vmem:[%s713_s3 + $0x20] sm:$0xff]  ;;  %v141_v19 = vld [vmem:[%s713_s3 + $0x10] sm:$0xff]  ;;  %v140_v20 = vld [vmem:[%s713_s3 + $0x8] sm:$0xff] }
  0x23   :  { %382 = vmatpush3.msra.mxu0 %v54_v4  ;;  %393 = vmatpush3.msra.mxu1 %v152_v6  ;;  %v139_v21 = vld [vmem:[%s713_s3] sm:$0xff]  ;;  %v248_v22 = vld [vmem:[%s715_s5 + $0x78] sm:$0xff]  ;;  %v247_v23 = vld [vmem:[%s715_s5 + $0x70] sm:$0xff] }
  0x24   :  { %383 = vmatprep.subr.mxu0 %v512_v0  ;;  %394 = vmatprep.subr.mxu1 %v512_v0  ;;  %v246_v24 = vld [vmem:[%s715_s5 + $0x68] sm:$0xff]  ;;  %v245_v25 = vld [vmem:[%s715_s5 + $0x60] sm:$0xff]  ;;  %v244_v26 = vld [vmem:[%s715_s5 + $0x58] sm:$0xff] }
  0x25   :  { %384 = vmatpush3.msra.mxu0 %v53_v7  ;;  %395 = vmatpush3.msra.mxu1 %v151_v9  ;;  %v243_v27 = vld [vmem:[%s715_s5 + $0x50] sm:$0xff]  ;;  %v242_v28 = vld [vmem:[%s715_s5 + $0x48] sm:$0xff]  ;;  %v241_v29 = vld [vmem:[%s715_s5 + $0x40] sm:$0xff] }
  0x26   :  { %386 = vmatmul.mubr.msk.f32.vlgmr.msra.gmra.mxu0 %vm64_vm1, %v52_v8  ;;  %396 = vmatprep.subr.mxu1 %v512_v0  ;;  %v240_v30 = vld [vmem:[%s715_s5 + $0x38] sm:$0xff]  ;;  %v239_v31 = vld [vmem:[%s715_s5 + $0x30] sm:$0xff]  ;;  %v238_v32 = vld [vmem:[%s715_s5 + $0x28] sm:$0xff] }
  0x27   :  { %423 = vmatprep.subr.mxu0 %v512_v0  ;;  %397 = vmatpush3.msra.mxu1 %v150_v10  ;;  %v237_v33 = vld [vmem:[%s715_s5 + $0x20] sm:$0xff]  ;;  %v236_v34 = vld [vmem:[%s715_s5 + $0x18] sm:$0xff]  ;;  %v235_v40 = vld [vmem:[%s715_s5 + $0x10] sm:$0xff] }
  0x28   :  { %455 = vmatprep.mubr.msk.f32.mxu0 %vm513_vm0, %v512_v0  ;;  %398 = vmatprep.subr.mxu1 %v512_v0  ;;  %v334_v35 = vld [vmem:[%s712_s2] ss:$0 sm:$0xff]  ;;  %v234_v41 = vld [vmem:[%s715_s5 + $0x8] sm:$0xff] }
  0x29   :  { %399 = vmatpush3.msra.mxu1 %v149_v11  ;;  %424 = vmatpush3.msra.mxu0 %v248_v22  ;;  %v233_v42 = vld [vmem:[%s715_s5] sm:$0xff] }
  0x2a   :  { %400 = vmatprep.subr.mxu1 %v512_v0  ;;  %425 = vmatprep.subr.mxu0 %v512_v0  ;;  %v336_v43 = vld [vmem:[#allocation4] ss:$0 sm:$0xff] }
  0x2b   :  { %401 = vmatpush3.msra.mxu1 %v148_v12  ;;  %426 = vmatpush3.msra.mxu0 %v247_v23  ;;  %v337_v48 = vld [vmem:[%s716_s6] ss:$0 sm:$0xff] }
  0x2c   :  { %402 = vmatprep.subr.mxu1 %v512_v0  ;;  %427 = vmatprep.subr.mxu0 %v512_v0 }
  0x2d   :  { %403 = vmatpush3.msra.mxu1 %v147_v13  ;;  %428 = vmatpush3.msra.mxu0 %v246_v24 }
  0x2e   :  { %404 = vmatprep.subr.mxu1 %v512_v0  ;;  %429 = vmatprep.subr.mxu0 %v512_v0 }
  0x2f   :  { %405 = vmatpush3.msra.mxu1 %v146_v14  ;;  %430 = vmatpush3.msra.mxu0 %v245_v25 }
  0x30   :  { %406 = vmatprep.subr.mxu1 %v512_v0  ;;  %431 = vmatprep.subr.mxu0 %v512_v0 }
  0x31   :  { %407 = vmatpush3.msra.mxu1 %v145_v15  ;;  %432 = vmatpush3.msra.mxu0 %v244_v26 }
  0x32   :  { %408 = vmatprep.subr.mxu1 %v512_v0  ;;  %433 = vmatprep.subr.mxu0 %v512_v0 }
  0x33   :  { %409 = vmatpush3.msra.mxu1 %v144_v16  ;;  %434 = vmatpush3.msra.mxu0 %v243_v27 }
  0x34   :  { %410 = vmatprep.subr.mxu1 %v512_v0  ;;  %435 = vmatprep.subr.mxu0 %v512_v0 }
  0x35   :  { %411 = vmatpush3.msra.mxu1 %v143_v17  ;;  %436 = vmatpush3.msra.mxu0 %v242_v28 }
  0x36   :  { %412 = vmatprep.subr.mxu1 %v512_v0  ;;  %437 = vmatprep.subr.mxu0 %v512_v0 }
  0x37   :  { %413 = vmatpush3.msra.mxu1 %v142_v18  ;;  %438 = vmatpush3.msra.mxu0 %v241_v29 }
  0x38   :  { %414 = vmatprep.subr.mxu1 %v512_v0  ;;  %439 = vmatprep.subr.mxu0 %v512_v0 }
  0x39   :  { %415 = vmatpush3.msra.mxu1 %v141_v19  ;;  %440 = vmatpush3.msra.mxu0 %v240_v30 }
  0x3a   :  { %416 = vmatprep.subr.mxu1 %v512_v0  ;;  %441 = vmatprep.subr.mxu0 %v512_v0 }
  0x3b   :  { %417 = vmatpush3.msra.mxu1 %v140_v20  ;;  %442 = vmatpush3.msra.mxu0 %v239_v31 }
  0x3c   :  { %418 = vmatprep.subr.mxu1 %v512_v0  ;;  %443 = vmatprep.subr.mxu0 %v512_v0 }
  0x3d   :  { %419 = vmatpush3.msra.mxu1 %v139_v21  ;;  %444 = vmatpush3.msra.mxu0 %v238_v32 }
  0x3e   :  { %445 = vmatprep.subr.mxu0 %v512_v0 }
  0x3f   :  { %446 = vmatpush3.msra.mxu0 %v237_v33 }
  0x40   :  { %447 = vmatprep.subr.mxu0 %v512_v0 }
  0x41   :  { %448 = vmatpush3.msra.mxu0 %v236_v34 }
  0x42   :  { %449 = vmatprep.subr.mxu0 %v512_v0 }
  0x43   :  { %450 = vmatpush3.msra.mxu0 %v235_v40 }
  0x44   :  { %451 = vmatprep.subr.mxu0 %v512_v0 }
  0x45   :  { %452 = vmatpush3.msra.mxu0 %v234_v41 }
  0x46   :  { %453 = vmatprep.subr.mxu0 %v512_v0 }
  0x47   :  { %454 = vmatpush3.msra.mxu0 %v233_v42 }
  0xe6   :  { %v134_v36 = vpop.f32.mrf.mxu0 }
  0xe7   :  { %v135_v37 = vadd.f32 %v334_v35, %v134_v36 }
  0xe8   :  { %v387_v38 = vpop.f32.mrf.mxu0 }
  0xe9   :  { %v138_v39 = vmax.f32 %v135_v37, 0.0 }
  0xeb   :  { %421 = vmatmul.mubr.f32.vlgmr.msra.gmra.mxu1 %v138_v39 }
 0x1ab   :  { %v228_v44 = vpop.f32.mrf.mxu1 }
 0x1ac   :  { %v229_v45 = vadd.f32 %v336_v43, %v228_v44 }
 0x1ad   :  { %v422_v46 = vpop.f32.mrf.mxu1 }
 0x1ae   :  { %v232_v47 = vmax.f32 %v229_v45, 0.0 }
 0x1b0   :  { %456 = vmatmul.mubr.f32.vlgmr.msra.gmra.mxu0 %v232_v47 }
 0x270   :  { %v322_v49 = vpop.f32.mrf.mxu0 }
 0x271   :  { %v323_v50 = vadd.f32 %v337_v48, %v322_v49 }
 0x272   :  { %v457_v51 = vpop.f32.mrf.mxu0 }
 0x273   :  { %327 = vst.msk [vmem:[%s717_s7] sm:$0xff] %vm326_vm2, %v323_v50 }
 0x274   :  { %332 = vsyncpa [#allocation3], 1 }
 0x275   :  { %333 = vsyncpa [#allocation5], 1 }

</bundles_post_ra>
